<compile_context>
chip_gen: v6e
topology: v6e:2x2x1
jax: 0.10.0
libtpu: 0.0.40
codegen_flags: <defaults>
</compile_context>

<pallas_src>
import math
from functools import partial

import numpy as np
import jax
import jax.numpy as jnp
from jax.experimental import pallas as pl
from jax.experimental.pallas import tpu as pltpu

_INV_SQRT_2 = 1.0 / math.sqrt(2.0)
_MM_DTYPE = jnp.bfloat16            # MXU input dtype (accumulate in f32)


def _detect_vmem_capacity():
    try:
        info = pltpu.get_tpu_info()
        for name in ("vmem_capacity_bytes", "vmem_bytes"):
            cap = getattr(info, name, None)
            if cap:
                return int(cap)
    except Exception:
        pass
    return 64 * 1024 * 1024         # conservative (v7x-sized) fallback


_VMEM_CAPACITY = _detect_vmem_capacity()
if _VMEM_CAPACITY >= 128 * 1024 * 1024:     # v5e / v6e
    _VMEM_LIMIT = 64 * 1024 * 1024
    _MAX_M_TILE = 512
else:                                       # v7x (64 MiB) or unknown
    _VMEM_LIMIT = 48 * 1024 * 1024
    _MAX_M_TILE = 256


def _round_up(x, m):
    return ((x + m - 1) // m) * m


def _m_tile(m):
    return min(_MAX_M_TILE, _round_up(m, 8))


def _heads_per_group(num_heads, head_dim):
    # Group heads so a group spans 128 lanes (one vreg width) when possible.
    if head_dim % 128 == 0:
        return 1
    if 128 % head_dim == 0:
        g = 128 // head_dim
        if num_heads % g == 0:
            return g
    return num_heads                 # fallback: all heads in one group (full width)


def _qkv_group_permutation(d, num_heads):
    # Column permutation of the (D, 3D) qkv weight into head-group-major order:
    # [Q(group0) K(group0) V(group0) | Q(group1) ...].  Identity when 1 group.
    hd = d // num_heads
    hpg = _heads_per_group(num_heads, hd)
    idx = []
    for g0 in range(0, num_heads, hpg):
        for sec in range(3):                       # Q, K, V sections
            for h in range(g0, g0 + hpg):
                idx.extend(range(sec * d + h * hd, sec * d + (h + 1) * hd))
    return np.asarray(idx, dtype=np.int32)


def _compiler_params(dims):
    return pltpu.CompilerParams(dimension_semantics=dims,
                                vmem_limit_bytes=_VMEM_LIMIT)


# ----------------------------------------------------------------------------
# In-kernel math helpers
# ----------------------------------------------------------------------------
def _erf_f32(x):
    # Abramowitz & Stegun 7.1.26 rational approximation, |err| <= 1.5e-7
    # (matches torch's exact-erf nn.GELU at f32 accuracy).
    p = 0.3275911
    a1, a2, a3, a4, a5 = (0.254829592, -0.284496736, 1.421413741,
                          -1.453152027, 1.061405429)
    sgn = jnp.where(x >= 0.0, 1.0, -1.0)
    ax = jnp.abs(x)
    t = 1.0 / (1.0 + p * ax)
    poly = ((((a5 * t + a4) * t + a3) * t + a2) * t + a1) * t
    return sgn * (1.0 - poly * jnp.exp(-ax * ax))


def _gelu(y):
    return 0.5 * y * (1.0 + _erf_f32(y * _INV_SQRT_2))


def _layernorm_f32(x, g, b, eps):
    mean = jnp.mean(x, axis=-1, keepdims=True)
    xc = x - mean
    var = jnp.mean(xc * xc, axis=-1, keepdims=True)
    return (xc * jax.lax.rsqrt(var + eps)) * g + b


# ----------------------------------------------------------------------------
# Pallas kernels
# ----------------------------------------------------------------------------
def _linear_kernel(x_ref, w_ref, b_ref, o_ref):
    # y = x @ w + b       (w already bf16)
    y = jnp.dot(x_ref[...].astype(_MM_DTYPE), w_ref[...],
                preferred_element_type=jnp.float32) + b_ref[...]
    o_ref[...] = y.astype(o_ref.dtype)


def _ln_linear_kernel(x_ref, g_ref, bb_ref, w_ref, b_ref, o_ref, *, eps):
    # y = LayerNorm(x) @ w + b
    h = _layernorm_f32(x_ref[...].astype(jnp.float32), g_ref[...], bb_ref[...], eps)
    y = jnp.dot(h.astype(_MM_DTYPE), w_ref[...],
                preferred_element_type=jnp.float32) + b_ref[...]
    o_ref[...] = y.astype(o_ref.dtype)


def _mlp_block_kernel(x_ref, ng_ref, nb_ref, w1_ref, b1_ref, w2_ref, b2_ref,
                      o_ref, *, eps):
    # o = x + fc2(gelu(fc1(LayerNorm(x))))   -- full MLP branch fused
    x = x_ref[...].astype(jnp.float32)
    h = _layernorm_f32(x, ng_ref[...], nb_ref[...], eps)
    h = jnp.dot(h.astype(_MM_DTYPE), w1_ref[...],
                preferred_element_type=jnp.float32) + b1_ref[...]
    h = _gelu(h)                                                # (bm, hidden) f32, VMEM-resident
    y = jnp.dot(h.astype(_MM_DTYPE), w2_ref[...],
                preferred_element_type=jnp.float32) + b2_ref[...]
    o_ref[...] = (x + y).astype(o_ref.dtype)


def _attn_block_kernel(x_ref, g1_ref, b1_ref, wqkv_ref, bqkv_ref, wp_ref,
                       bp_ref, o_ref, xn_ref, *, heads_per_group, head_dim,
                       scale, eps):
    # One (batch, head-group) program:
    #   o  = x + bias_proj                                    (group 0)
    #   o += concat_h(softmax(q_h k_h^T * s) v_h) @ W_proj_g  (every group)
    grp = pl.program_id(1)

    @pl.when(grp == 0)
    def _():
        x = x_ref[...].astype(jnp.float32)
        h = _layernorm_f32(x, g1_ref[...], b1_ref[...], eps)
        xn_ref[...] = h.astype(xn_ref.dtype)                    # cached LN(x), bf16
        o_ref[...] = (x + bp_ref[...]).astype(o_ref.dtype)      # residual + proj bias

    gw = heads_per_group * head_dim
    # qkv projection for this head group (contraction over full D, 3*gw wide)
    qkv = jnp.dot(xn_ref[...], wqkv_ref[...],
                  preferred_element_type=jnp.float32) + bqkv_ref[...]
    q_all = qkv[:, 0 * gw:1 * gw].astype(_MM_DTYPE)              # lane-aligned slices
    k_all = qkv[:, 1 * gw:2 * gw].astype(_MM_DTYPE)
    v_all = qkv[:, 2 * gw:3 * gw].astype(_MM_DTYPE)

    outs = []
    for h in range(heads_per_group):
        sl = slice(h * head_dim, (h + 1) * head_dim)
        q = q_all[:, sl]
        k = k_all[:, sl]
        v = v_all[:, sl]
        s = jax.lax.dot_general(q, k, (((1,), (1,)), ((), ())),
                                preferred_element_type=jnp.float32) * scale
        s = s - jnp.max(s, axis=-1, keepdims=True)
        p = jnp.exp(s)
        p = p * pl.reciprocal(jnp.sum(p, axis=-1, keepdims=True), approx=True)
        outs.append(jnp.dot(p.astype(_MM_DTYPE), v,
                            preferred_element_type=jnp.float32))
    grp_out = outs[0] if heads_per_group == 1 else jnp.concatenate(outs, axis=-1)
    y = jnp.dot(grp_out.astype(_MM_DTYPE), wp_ref[...],          # (gw, D) 128-deep contraction
                preferred_element_type=jnp.float32)
    o_ref[...] += y.astype(o_ref.dtype)


# ----------------------------------------------------------------------------
# Pallas wrappers
# ----------------------------------------------------------------------------
def pallas_linear(x2d, w, b):
    m, k = x2d.shape
    n = w.shape[1]
    bm = _m_tile(m)
    cost = pl.CostEstimate(flops=2 * m * k * n, transcendentals=0,
                           bytes_accessed=4 * m * (k + n) + 2 * k * n + 4 * n)
    return pl.pallas_call(
        _linear_kernel,
        out_shape=jax.ShapeDtypeStruct((m, n), jnp.float32),
        grid=(pl.cdiv(m, bm),),
        in_specs=[pl.BlockSpec((bm, k), lambda i: (i, 0)),
                  pl.BlockSpec((k, n), lambda i: (0, 0)),
                  pl.BlockSpec((1, n), lambda i: (0, 0))],
        out_specs=pl.BlockSpec((bm, n), lambda i: (i, 0)),
        compiler_params=_compiler_params(("parallel",)),
        cost_estimate=cost,
    )(x2d, w, b.reshape(1, n))


def pallas_ln_linear(x2d, gamma, beta, w, b, eps=1e-5):
    m, d = x2d.shape
    n = w.shape[1]
    bm = _m_tile(m)
    cost = pl.CostEstimate(flops=2 * m * d * n, transcendentals=0,
                           bytes_accessed=4 * m * (d + n) + 2 * d * n + 12 * d + 4 * n)
    return pl.pallas_call(
        partial(_ln_linear_kernel, eps=eps),
        out_shape=jax.ShapeDtypeStruct((m, n), jnp.float32),
        grid=(pl.cdiv(m, bm),),
        in_specs=[pl.BlockSpec((bm, d), lambda i: (i, 0)),
                  pl.BlockSpec((1, d), lambda i: (0, 0)),
                  pl.BlockSpec((1, d), lambda i: (0, 0)),
                  pl.BlockSpec((d, n), lambda i: (0, 0)),
                  pl.BlockSpec((1, n), lambda i: (0, 0))],
        out_specs=pl.BlockSpec((bm, n), lambda i: (i, 0)),
        compiler_params=_compiler_params(("parallel",)),
        cost_estimate=cost,
    )(x2d, gamma.reshape(1, d), beta.reshape(1, d), w, b.reshape(1, n))


def pallas_mlp_block(x2d, ng, nb, w1, b1, w2, b2, eps=1e-5):
    m, d = x2d.shape
    hidden = w1.shape[1]
    bm = _m_tile(m)
    cost = pl.CostEstimate(flops=4 * m * d * hidden, transcendentals=m * hidden,
                           bytes_accessed=8 * m * d + 4 * d * hidden + 4 * (2 * d + hidden))
    return pl.pallas_call(
        partial(_mlp_block_kernel, eps=eps),
        out_shape=jax.ShapeDtypeStruct((m, d), jnp.float32),
        grid=(pl.cdiv(m, bm),),
        in_specs=[pl.BlockSpec((bm, d), lambda i: (i, 0)),
                  pl.BlockSpec((1, d), lambda i: (0, 0)),
                  pl.BlockSpec((1, d), lambda i: (0, 0)),
                  pl.BlockSpec((d, hidden), lambda i: (0, 0)),
                  pl.BlockSpec((1, hidden), lambda i: (0, 0)),
                  pl.BlockSpec((hidden, d), lambda i: (0, 0)),
                  pl.BlockSpec((1, d), lambda i: (0, 0))],
        out_specs=pl.BlockSpec((bm, d), lambda i: (i, 0)),
        compiler_params=_compiler_params(("parallel",)),
        cost_estimate=cost,
    )(x2d, ng.reshape(1, d), nb.reshape(1, d), w1, b1.reshape(1, hidden),
      w2, b2.reshape(1, d))


def pallas_attn_block(x, norm_g, norm_b, qkv_w, qkv_b, proj_w, proj_b, *,
                      num_heads, scale, eps=1e-5):
    bsz, t, d = x.shape
    hd = d // num_heads
    hpg = _heads_per_group(num_heads, hd)
    ng = num_heads // hpg
    gw = hpg * hd
    cost = pl.CostEstimate(
        flops=bsz * (8 * t * d * d + 4 * t * t * d),
        transcendentals=bsz * num_heads * t * t,
        bytes_accessed=8 * bsz * t * d + 2 * (3 * d * d + d * d) + 4 * (6 * d))
    kernel = partial(_attn_block_kernel, heads_per_group=hpg, head_dim=hd,
                     scale=scale, eps=eps)
    return pl.pallas_call(
        kernel,
        out_shape=jax.ShapeDtypeStruct((bsz, t, d), jnp.float32),
        grid=(bsz, ng),
        in_specs=[pl.BlockSpec((None, t, d), lambda b, g: (b, 0, 0)),
                  pl.BlockSpec((1, d), lambda b, g: (0, 0)),
                  pl.BlockSpec((1, d), lambda b, g: (0, 0)),
                  pl.BlockSpec((d, 3 * gw), lambda b, g: (0, g)),
                  pl.BlockSpec((1, 3 * gw), lambda b, g: (0, g)),
                  pl.BlockSpec((gw, d), lambda b, g: (g, 0)),
                  pl.BlockSpec((1, d), lambda b, g: (0, 0))],
        out_specs=pl.BlockSpec((None, t, d), lambda b, g: (b, 0, 0)),
        scratch_shapes=[pltpu.VMEM((t, d), _MM_DTYPE)],   # cached LN(x), persists across groups
        compiler_params=_compiler_params(("parallel", "arbitrary")),
        cost_estimate=cost,
    )(x, norm_g.reshape(1, d), norm_b.reshape(1, d),
      qkv_w, qkv_b.reshape(1, 3 * d), proj_w, proj_b.reshape(1, d))


# ----------------------------------------------------------------------------
# Plain-JAX glue (mask gathers, sincos pos-embed, parameter init)
# ----------------------------------------------------------------------------
def _1d_sincos(embed_dim, pos):
    omega = np.arange(embed_dim // 2, dtype=np.float64) / (embed_dim / 2.0)
    omega = 1.0 / 10000 ** omega
    out = np.einsum("m,d->md", pos.reshape(-1), omega)
    return np.concatenate([np.sin(out), np.cos(out)], axis=1)


def get_2d_sincos_pos_embed(embed_dim, grid_size):
    grid_h = np.arange(grid_size, dtype=np.float32)
    grid_w = np.arange(grid_size, dtype=np.float32)
    grid = np.meshgrid(grid_w, grid_h)              # w first (matches reference)
    grid = np.stack(grid, axis=0).reshape([2, 1, grid_size, grid_size])
    emb_h = _1d_sincos(embed_dim // 2, grid[0])
    emb_w = _1d_sincos(embed_dim // 2, grid[1])
    return np.concatenate([emb_h, emb_w], axis=1)   # (grid_size**2, embed_dim)


def apply_masks(x, masks):
    # x: (B, N, D); each mask: (B, K) int indices -> concat along batch.
    bsz = x.shape[0]
    rows = jnp.arange(bsz)[:, None]
    return jnp.concatenate([x[rows, m] for m in masks], axis=0)


def repeat_interleave_batch(x, b, repeat):
    n = x.shape[0] // b
    x = x.reshape((n, b) + x.shape[1:])
    x = jnp.broadcast_to(x[:, None], (n, repeat, b) + x.shape[2:])
    return x.reshape((n * repeat * b,) + x.shape[3:])


def _trunc_normal(key, shape, std=0.02):
    return (std * jax.random.truncated_normal(key, -2.0, 2.0, shape)).astype(jnp.float32)


def init_params(key, num_patches, embed_dim, pred_dim, depth, num_heads,
                mlp_ratio, init_std=0.02):
    hidden = int(pred_dim * mlp_ratio)
    keys = iter(jax.random.split(key, 4 * depth + 4))
    # qkv columns stored head-group-major (identity when one group); matmul
    # weights stored bf16 (halves DMA traffic / VMEM; f32 accumulation kept).
    perm = _qkv_group_permutation(pred_dim, num_heads)
    params = {
        "embed_w": _trunc_normal(next(keys), (embed_dim, pred_dim), init_std).astype(_MM_DTYPE),
        "embed_b": jnp.zeros((pred_dim,), jnp.float32),
        "mask_token": _trunc_normal(next(keys), (pred_dim,), init_std),
        "pos_embed": jnp.asarray(
            get_2d_sincos_pos_embed(pred_dim, int(num_patches ** 0.5)),
            dtype=jnp.float32),
        "norm_g": jnp.ones((pred_dim,), jnp.float32),
        "norm_b": jnp.zeros((pred_dim,), jnp.float32),
        "proj_w": _trunc_normal(next(keys), (pred_dim, embed_dim), init_std).astype(_MM_DTYPE),
        "proj_b": jnp.zeros((embed_dim,), jnp.float32),
        "blocks": [],
    }
    for _ in range(depth):
        qkv_w = _trunc_normal(next(keys), (pred_dim, 3 * pred_dim), init_std)
        qkv_b = jnp.zeros((3 * pred_dim,), jnp.float32)
        params["blocks"].append({
            "norm1_g": jnp.ones((pred_dim,), jnp.float32),
            "norm1_b": jnp.zeros((pred_dim,), jnp.float32),
            "qkv_w": qkv_w[:, perm].astype(_MM_DTYPE),
            "qkv_b": qkv_b[perm],
            "proj_w": _trunc_normal(next(keys), (pred_dim, pred_dim), init_std).astype(_MM_DTYPE),
            "proj_b": jnp.zeros((pred_dim,), jnp.float32),
            "norm2_g": jnp.ones((pred_dim,), jnp.float32),
            "norm2_b": jnp.zeros((pred_dim,), jnp.float32),
            "fc1_w": _trunc_normal(next(keys), (pred_dim, hidden), init_std).astype(_MM_DTYPE),
            "fc1_b": jnp.zeros((hidden,), jnp.float32),
            "fc2_w": _trunc_normal(next(keys), (hidden, pred_dim), init_std).astype(_MM_DTYPE),
            "fc2_b": jnp.zeros((pred_dim,), jnp.float32),
        })
    return params


# ----------------------------------------------------------------------------
# Transformer block + full predictor forward (semantics of the torch module)
# ----------------------------------------------------------------------------
def block_forward(p, x, num_heads):
    bsz, t, d = x.shape
    scale = (d // num_heads) ** -0.5
    # attention branch (drop rates are 0):  x + proj(attn(norm1(x)))  -- one fused kernel
    x = pallas_attn_block(x, p["norm1_g"], p["norm1_b"], p["qkv_w"], p["qkv_b"],
                          p["proj_w"], p["proj_b"], num_heads=num_heads, scale=scale)
    # MLP branch:  x + fc2(gelu(fc1(norm2(x))))  -- one fused kernel
    x = pallas_mlp_block(x.reshape(-1, d), p["norm2_g"], p["norm2_b"],
                         p["fc1_w"], p["fc1_b"], p["fc2_w"], p["fc2_b"]
                         ).reshape(bsz, t, d)
    return x


def vit_predictor_forward(params, x, masks_x, masks, num_heads):
    if not isinstance(masks_x, (list, tuple)):
        masks_x = [masks_x]
    if not isinstance(masks, (list, tuple)):
        masks = [masks]

    b_full, n_ctxt, embed_dim = x.shape
    b = b_full // len(masks_x)
    pred_dim = params["embed_w"].shape[1]

    # predictor_embed (Linear) — Pallas matmul
    x = pallas_linear(x.reshape(-1, embed_dim), params["embed_w"],
                      params["embed_b"]).reshape(b_full, n_ctxt, pred_dim)

    # add positional embedding of the context tokens
    # TODO(synk): mask-index gathers / token concat stay in plain JAX (no rectangular tiling).
    pos = jnp.broadcast_to(params["pos_embed"][None],
                           (b,) + params["pos_embed"].shape)
    x = x + apply_masks(pos, masks_x)

    # build mask (prediction) tokens at the target positions
    pos_embs = apply_masks(pos, masks)
    pos_embs = repeat_interleave_batch(pos_embs, b, repeat=len(masks_x))
    pred_tokens = params["mask_token"][None, None, :] + pos_embs

    x = jnp.tile(x, (len(masks), 1, 1))
    x = jnp.concatenate([x, pred_tokens], axis=1)

    for blk in params["blocks"]:
        x = block_forward(blk, x, num_heads)

    # Final LayerNorm is per-token, so slicing the target tokens first is
    # equivalent to torch's norm-then-slice; fuse the norm into the output
    # projection matmul.
    x = x[:, n_ctxt:]
    bt, n_pred, _ = x.shape
    out = pallas_ln_linear(x.reshape(-1, pred_dim), params["norm_g"],
                           params["norm_b"], params["proj_w"],
                           params["proj_b"]).reshape(bt, n_pred, embed_dim)
    return out


# ----------------------------------------------------------------------------
# main
# ----------------------------------------------------------------------------
if __name__ == "__main__":
    # small, lane-friendly configuration (pred_dim multiple of 128)
    num_patches = 16          # 4x4 patch grid (square, as required by sincos)
    embed_dim = 128
    predictor_embed_dim = 128
    depth = 2
    num_heads = 4             # head_dim = 32 -> one 128-lane head group
    mlp_ratio = 4.0
    B = 2
    n_ctxt = 8                # context tokens per sample
    n_tgt = 4                 # masked/target tokens per sample

    key = jax.random.PRNGKey(0)
    k_param, k_x = jax.random.split(key)
    params = init_params(k_param, num_patches, embed_dim, predictor_embed_dim,
                         depth, num_heads, mlp_ratio)

    # x: context-encoded tokens (B, n_ctxt, embed_dim)
    x = jax.random.normal(k_x, (B, n_ctxt, embed_dim), dtype=jnp.float32)
    # deterministic patch-index masks (single mask per list, as tensors)
    masks_x = jnp.stack([jnp.arange(0, n_ctxt, dtype=jnp.int32),
                         jnp.arange(4, 4 + n_ctxt, dtype=jnp.int32)])   # (B, 8)
    masks = jnp.stack([jnp.arange(8, 8 + n_tgt, dtype=jnp.int32),
                       jnp.arange(0, n_tgt, dtype=jnp.int32)])          # (B, 4)

    out = vit_predictor_forward(params, x, masks_x, masks, num_heads=num_heads)
    out = jax.block_until_ready(out)
    assert out.shape == (B, n_tgt, embed_dim), out.shape
    assert bool(jnp.all(jnp.isfinite(out)))
    print("KERNEL_OK")
</pallas_src>

<mosaic_0001>
module attributes {stable_mosaic.version = 11 : i64} {
  func.func @_linear_kernel(%arg0: i32, %arg1: memref<16x128xf32, #tpu.memory_space<vmem>>, %arg2: memref<128x128xbf16, #tpu.memory_space<vmem>>, %arg3: memref<1x128xf32, #tpu.memory_space<vmem>>, %arg4: memref<16x128xf32, #tpu.memory_space<vmem>>) attributes {dimension_semantics = [#tpu.dimension_semantics<parallel>], iteration_bounds = array<i64: 1>, scalar_prefetch = 0 : i64, scratch_operands = 0 : i64, tpu.core_type = #tpu.core_type<tc>, window_params = [{transform_indices = @transform_0, window_bounds = array<i64: 16, 128>}, {pipeline_mode = #tpu.pipeline_mode<synchronous>, transform_indices = @transform_1, window_bounds = array<i64: 128, 128>}, {pipeline_mode = #tpu.pipeline_mode<synchronous>, transform_indices = @transform_2, window_bounds = array<i64: 1, 128>}, {transform_indices = @transform_3, window_bounds = array<i64: 16, 128>}]} {
    %c0 = arith.constant 0 : index
    %c0_0 = arith.constant 0 : index
    %0 = vector.load %arg1[%c0, %c0_0] : memref<16x128xf32, #tpu.memory_space<vmem>>, vector<16x128xf32>
    %1 = arith.truncf %0 : vector<16x128xf32> to vector<16x128xbf16>
    %c0_1 = arith.constant 0 : index
    %c0_2 = arith.constant 0 : index
    %2 = vector.load %arg2[%c0_1, %c0_2] : memref<128x128xbf16, #tpu.memory_space<vmem>>, vector<128x128xbf16>
    %cst = arith.constant dense<0.000000e+00> : vector<16x128xf32>
    %3 = tpu.matmul %1, %2, %cst {dimension_numbers = #tpu.dot_dimension_numbers<[1], [0], [0], [1], [0, 0, 1, 1], [], []>} : vector<16x128xbf16>, vector<128x128xbf16>, vector<16x128xf32> -> vector<16x128xf32>
    %c0_3 = arith.constant 0 : index
    %c0_4 = arith.constant 0 : index
    %4 = vector.load %arg3[%c0_3, %c0_4] : memref<1x128xf32, #tpu.memory_space<vmem>>, vector<1x128xf32>
    %5 = vector.broadcast %4 : vector<1x128xf32> to vector<16x128xf32>
    %6 = arith.addf %3, %5 : vector<16x128xf32>
    %c0_5 = arith.constant 0 : index
    %c0_6 = arith.constant 0 : index
    %7 = vector.load %arg4[%c0_5, %c0_6] : memref<16x128xf32, #tpu.memory_space<vmem>>, vector<16x128xf32>
    tpu.vector_store %arg4[%c0_5, %c0_6], %6 {strides = array<i32>} : memref<16x128xf32, #tpu.memory_space<vmem>>, vector<16x128xf32>,
    return
  }
  func.func @transform_0(%arg0: i32) -> (i32, i32) {
    %c0_i32 = arith.constant 0 : i32
    %c0_i32_0 = arith.constant 0 : i32
    return %arg0, %c0_i32 : i32, i32
  }
  func.func @transform_1(%arg0: i32) -> (i32, i32) {
    %c0_i32 = arith.constant 0 : i32
    %c0_i32_0 = arith.constant 0 : i32
    %c0_i32_1 = arith.constant 0 : i32
    return %c0_i32, %c0_i32_0 : i32, i32
  }
  func.func @transform_2(%arg0: i32) -> (i32, i32) {
    %c0_i32 = arith.constant 0 : i32
    %c0_i32_0 = arith.constant 0 : i32
    %c0_i32_1 = arith.constant 0 : i32
    return %c0_i32, %c0_i32_0 : i32, i32
  }
  func.func @transform_3(%arg0: i32) -> (i32, i32) {
    %c0_i32 = arith.constant 0 : i32
    %c0_i32_0 = arith.constant 0 : i32
    return %arg0, %c0_i32 : i32, i32
  }
}

</mosaic_0001>

<bundles_post_ra>
// kernel: tpu_custom_call.1
= control target key start
LH: loop header
LB: loop body
LE: loop exit
PB: predicated region body
PF: predicated region fallthrough
CT: control target
= control target key end

     0   :  { %8 = vsyncpa [#allocation3], 0  ;;  %s347_s0 = inlined_call_operand.hbm [shape: f32[16,128], index: 0, kind: input, shape index: {}]   ;;  %s348_s1 = inlined_call_operand.hbm [shape: bf16[128,128], index: 1, kind: input, shape index: {}]   ;;  %s349_s2 = inlined_call_operand.vmem [shape: f32[1,128], index: 2, kind: input, shape index: {}]   ;;  %s350_s3 = inlined_call_operand.hbm [shape: f32[16,128], index: 3, kind: output, shape index: {}]  }
   0x1   :  { %9 = vsyncpa [#allocation6], 0 }
   0x2   :  { %10 = vsyncpa [#allocation4], 0  ;;  %s300_s12 = smov [#allocation2]  }
   0x3   :  { %s16_s13 = sshll.u32 %s300_s12, 4  ;;  %s17_s13 = int_to_ptr.vmem [resolvable:$true] %s16_s13 }
   0x4   :  { %s242_s14 = scalar_lea.vmem %s17_s13, 256  ;;  %p247_p1 = scmp.lt.s32.totalorder %s17_s13, %s17_s13 }
   0x5   :  { %p243_p0 = scmp.ne.s32.totalorder %s17_s13, %s242_s14  ;;  %p248_p2 = scmp.lt.s32.totalorder %s242_s14, %s242_s14 }
   0x7   :  { %p249_p3 = por %p248_p2, %p247_p1 }
   0x9   :  { %p250_p4 = pnand %p249_p3, %p243_p0 }
   0xb   :  { %253 = shalt.err (!%p250_p4)
}
   0xc   :  { %s301_s15 = smov 128   ;;  %s302_s16 = smov 8  }
   0xd   :  { %22 = dma.hbm_to_vmem [thread:$0]  %s347_s0, 256, %s17_s13, [#allocation3], %s301_s15, %s301_s15, %s302_s16  }
   0xe   :  { %s303_s19 = smov [#allocation5]  }
   0xf   :  { %s28_s20 = sshll.u32 %s303_s19, 4  ;;  %s29_s20 = int_to_ptr.vmem [resolvable:$true] %s28_s20 }
  0x10   :  { %s262_s21 = scalar_lea.vmem %s29_s20, 1024  ;;  %p267_p6 = scmp.lt.s32.totalorder %s29_s20, %s29_s20 }
  0x11   :  { %p263_p5 = scmp.ne.s32.totalorder %s29_s20, %s262_s21  ;;  %p268_p7 = scmp.lt.s32.totalorder %s262_s21, %s262_s21 }
  0x13   :  { %p269_p8 = por %p268_p7, %p267_p6 }
  0x15   :  { %p270_p9 = pnand %p269_p8, %p263_p5 }
  0x17   :  { %273 = shalt.err (!%p270_p9)
}
  0x18   :  { %s304_s22 = smov 64   ;;  %s305_s23 = smov 4  }
  0x19   :  { %34 = dma.hbm_to_vmem [thread:$0]  %s348_s1, 1024, %s29_s20, [#allocation6], %s304_s22, %s304_s22, %s305_s23  }
  0x1a   :  { %294 = dma.done.wait [#allocation3], 256  }
  0x1b   :  { %295 = vsyncadd [#allocation3], 4294967040 }
  0x1c   :  { %296 = dma.done.wait [#allocation6], 1024  }
  0x1d   :  { %297 = vsyncadd [#allocation6], 4294966272  ;;  %v306_v0 = vmov 0.0   ;;  %vm307_vm0 = vmmov 0   ;;  %v226_v1 = vld [vmem:[#allocation5 + $0x38] sm:$0xff]   ;;  %v227_v2 = vld [vmem:[#allocation5 + $0x30] sm:$0xff]  }
  0x1e   :  { %197 = vmatprep.subr.bf16.mxu0 %v306_v0  ;;  %213 = vmatprep.mubr.msk.bf16.mxu0 %vm307_vm0, %v306_v0  ;;  %v228_v3 = vld [vmem:[#allocation5 + $0x28] sm:$0xff]   ;;  %v229_v4 = vld [vmem:[#allocation5 + $0x20] sm:$0xff]   ;;  %v230_v5 = vld [vmem:[#allocation5 + $0x18] sm:$0xff]   ;;  %s308_s26 = smov [#allocation7]  }
  0x1f   :  { %198 = vmatpush3.bf16.msra.mxu0 %v226_v1  ;;  %v231_v6 = vld [vmem:[#allocation5 + $0x10] sm:$0xff]   ;;  %v232_v7 = vld [vmem:[#allocation5 + $0x8] sm:$0xff]   ;;  %v233_v8 = vld [vmem:[#allocation5] sm:$0xff]   ;;  %s166_s27 = sshll.u32 %s308_s26, 4  ;;  %s167_s27 = int_to_ptr.vmem [resolvable:$true] %s166_s27 }
  0x20   :  { %199 = vmatprep.subr.bf16.mxu0 %v306_v0  ;;  %v44_v9 = vld [vmem:[#allocation2] sm:$0xff]  ;;  %v45_v10 = vld [vmem:[#allocation2 + $0x8] sm:$0xff]  ;;  %s274_s28 = scalar_lea.vmem %s167_s27, 256  ;;  %p279_p11 = scmp.lt.s32.totalorder %s167_s27, %s167_s27 }
  0x21   :  { %v46_v11 = vpack.c.bf16 %v45_v10, %v44_v9  ;;  %v179_v12 = vld [vmem:[%s349_s2] ss:$0 sm:$0xff]  ;;  %p275_p10 = scmp.ne.s32.totalorder %s167_s27, %s274_s28  ;;  %p280_p12 = scmp.lt.s32.totalorder %s274_s28, %s274_s28 }
  0x23   :  { %200 = vmatpush3.bf16.msra.mxu0 %v227_v2  ;;  %p281_p13 = por %p280_p12, %p279_p11 }
  0x24   :  { %201 = vmatprep.subr.bf16.mxu0 %v306_v0 }
  0x25   :  { %p282_p0 = pnand %p281_p13, %p275_p10 }
  0x27   :  { %202 = vmatpush3.bf16.msra.mxu0 %v228_v3 }
  0x28   :  { %203 = vmatprep.subr.bf16.mxu0 %v306_v0 }
  0x2b   :  { %204 = vmatpush3.bf16.msra.mxu0 %v229_v4 }
  0x2c   :  { %205 = vmatprep.subr.bf16.mxu0 %v306_v0 }
  0x2f   :  { %206 = vmatpush3.bf16.msra.mxu0 %v230_v5 }
  0x30   :  { %207 = vmatprep.subr.bf16.mxu0 %v306_v0 }
  0x33   :  { %208 = vmatpush3.bf16.msra.mxu0 %v231_v6 }
  0x34   :  { %209 = vmatprep.subr.bf16.mxu0 %v306_v0 }
  0x37   :  { %210 = vmatpush3.bf16.msra.mxu0 %v232_v7 }
  0x38   :  { %211 = vmatprep.subr.bf16.mxu0 %v306_v0 }
  0x3b   :  { %212 = vmatpush3.bf16.msra.mxu0 %v233_v8 }
  0x3e   :  { %214 = vmatmul.mubr.bf16.vlgmr.msra.gmra.mxu0 %v46_v11 }
  0xfe   :  { %v152_v13 = vpop.f32.mrf.mxu0 }
  0xff   :  { %v153_v14 = vadd.f32 %v179_v12, %v152_v13 }
 0x100   :  { %v215_v15 = vpop.f32.mrf.mxu0 }
 0x101   :  { %159 = vst [vmem:[#allocation7] sm:$0xff] %v153_v14 }
 0x102   :  { %v155_v16 = vpop.f32.mrf.mxu0 }
 0x103   :  { %v156_v17 = vadd.f32 %v179_v12, %v155_v16 }
 0x104   :  { %v216_v18 = vpop.f32.mrf.mxu0 }
 0x105   :  { %160 = vst [vmem:[#allocation7 + $0x8] sm:$0xff] %v156_v17 }
 0x106   :  { %285 = shalt.err (!%p282_p0)
}
 0x107   :  { %172 = dma.vmem_to_hbm [thread:$0]  %s167_s27, 256, %s350_s3, [#allocation4], %s301_s15, %s301_s15, %s302_s16  }
 0x108   :  { %298 = dma.done.wait [#allocation4], 256  }
 0x109   :  { %299 = vsyncadd [#allocation4], 4294967040 }
 0x10a   :  { %176 = vsyncpa [#allocation3], 1 }
 0x10b   :  { %177 = vsyncpa [#allocation6], 1 }
 0x10c   :  { %178 = vsyncpa [#allocation4], 1 }

</bundles_post_ra>
